<compile_context>
chip_gen: v7x
topology: tpu7x:2x2x1
jax: 0.10.0
libtpu: 0.0.40
codegen_flags: <defaults>
</compile_context>

<pallas_src>
import jax
import jax.numpy as jnp
from jax.experimental import pallas as pl
from jax.experimental.pallas import tpu as pltpu


def _round_up(x, m):
    return ((x + m - 1) // m) * m


def _decoder_mlp_kernel_xy(x_ref, y_ref, w1x_ref, w1y_ref, b1_ref,
                           w2_ref, b2_ref, o_ref):
    """out = relu(x @ W1x + y @ W1y + b1) @ W2 + b2 (f32 accumulation)."""
    h = jnp.dot(x_ref[...], w1x_ref[...], preferred_element_type=jnp.float32)
    h = h + jnp.dot(y_ref[...], w1y_ref[...], preferred_element_type=jnp.float32)
    h = jnp.maximum(h + b1_ref[...], 0.0)                      # bias + ReLU (VPU)
    o = jnp.dot(h.astype(w2_ref.dtype), w2_ref[...],
                preferred_element_type=jnp.float32)
    o_ref[...] = (o + b2_ref[...]).astype(o_ref.dtype)


def _decoder_mlp_kernel_y(y_ref, w1y_ref, b1_ref, w2_ref, b2_ref, o_ref):
    """x_space == 0 branch: out = relu(y @ W1y + b1) @ W2 + b2."""
    h = jnp.dot(y_ref[...], w1y_ref[...], preferred_element_type=jnp.float32)
    h = jnp.maximum(h + b1_ref[...], 0.0)
    o = jnp.dot(h.astype(w2_ref.dtype), w2_ref[...],
                preferred_element_type=jnp.float32)
    o_ref[...] = (o + b2_ref[...]).astype(o_ref.dtype)


def decoder_forward(x_pt, y_pt, params, *, block_m=None,
                    compute_dtype=jnp.bfloat16):
    """Reproduces Decoder.forward: concat(flatten(x), flatten(y)) -> MLP."""
    w1, b1, w2, b2 = params
    n = y_pt.shape[0]
    x_flat = x_pt.reshape(n, -1)
    y_flat = y_pt.reshape(n, -1)
    d_x = x_flat.shape[1]
    d_z = y_flat.shape[1]
    d_h = w1.shape[1]
    d_out = w2.shape[1]
    assert w1.shape[0] == d_x + d_z, (w1.shape, d_x, d_z)

    # Lane-dense padding of the contraction/output feature dims.
    d_h_pad = _round_up(d_h, 128)
    d_out_pad = _round_up(d_out, 128)

    # Batch tile: 128..512 rows per grid step; pad batch so grid divides evenly.
    if block_m is None:
        block_m = min(512, _round_up(n, 128))
    n_pad = _round_up(n, block_m)
    grid_m = n_pad // block_m

    f32 = jnp.float32

    def pad2(a, rows, cols, dtype):
        a = a.astype(dtype)
        return jnp.pad(a, ((0, rows - a.shape[0]), (0, cols - a.shape[1])))

    # Split W1 so the concat never materializes; zero-pad hidden/output dims
    # (zero weight columns/rows + zero bias -> padded lanes contribute nothing).
    w1y_p = pad2(w1[d_x:], d_z, d_h_pad, compute_dtype)
    b1_p = pad2(b1.reshape(1, -1), 1, d_h_pad, f32)
    w2_p = pad2(w2, d_h_pad, d_out_pad, compute_dtype)
    b2_p = pad2(b2.reshape(1, -1), 1, d_out_pad, f32)
    y_p = pad2(y_flat, n_pad, d_z, compute_dtype)

    out_shape = jax.ShapeDtypeStruct((n_pad, d_out_pad), f32)
    out_spec = pl.BlockSpec((block_m, d_out_pad), lambda i: (i, 0))

    def resident(shape):            # grid-invariant, VMEM-resident operands
        return pl.BlockSpec(shape, lambda i: (0, 0))

    compiler_params = pltpu.CompilerParams(
        dimension_semantics=("parallel",),          # batch axis -> megacore
        vmem_limit_bytes=48 * 1024 * 1024,          # fits v7x 64 MiB VMEM
    )
    # TODO(synk): if d_h_pad * (d_x + d_z + d_out_pad) * 2 bytes ever exceeds
    # ~40 MiB, add a grid axis over d_h with an f32 accumulator (pl.when init).

    if d_x > 0:
        x_p = pad2(x_flat, n_pad, d_x, compute_dtype)
        w1x_p = pad2(w1[:d_x], d_x, d_h_pad, compute_dtype)
        out = pl.pallas_call(
            _decoder_mlp_kernel_xy,
            out_shape=out_shape,
            grid=(grid_m,),
            in_specs=[
                pl.BlockSpec((block_m, d_x), lambda i: (i, 0)),   # x tile
                pl.BlockSpec((block_m, d_z), lambda i: (i, 0)),   # y tile
                resident((d_x, d_h_pad)),                         # W1x
                resident((d_z, d_h_pad)),                         # W1y
                resident((1, d_h_pad)),                           # b1
                resident((d_h_pad, d_out_pad)),                   # W2
                resident((1, d_out_pad)),                         # b2
            ],
            out_specs=out_spec,
            compiler_params=compiler_params,
        )(x_p, y_p, w1x_p, w1y_p, b1_p, w2_p, b2_p)
    else:
        out = pl.pallas_call(
            _decoder_mlp_kernel_y,
            out_shape=out_shape,
            grid=(grid_m,),
            in_specs=[
                pl.BlockSpec((block_m, d_z), lambda i: (i, 0)),   # y tile
                resident((d_z, d_h_pad)),                         # W1y
                resident((1, d_h_pad)),                           # b1
                resident((d_h_pad, d_out_pad)),                   # W2
                resident((1, d_out_pad)),                         # b2
            ],
            out_specs=out_spec,
            compiler_params=compiler_params,
        )(y_p, w1y_p, b1_p, w2_p, b2_p)

    return out[:n, :d_out]


def init_decoder_params(key, x_space_size, z_space_size, hidden_size, y_space_size):
    """Deterministic synthetic parameters (nn.Linear shapes, transposed)."""
    d_in = x_space_size + z_space_size
    k1, k2 = jax.random.split(key, 2)
    w1 = jax.random.normal(k1, (d_in, hidden_size), jnp.float32) / jnp.sqrt(d_in)
    b1 = jnp.zeros((1, hidden_size), jnp.float32)
    w2 = jax.random.normal(k2, (hidden_size, y_space_size), jnp.float32) / jnp.sqrt(hidden_size)
    b2 = jnp.zeros((1, y_space_size), jnp.float32)
    return (w1, b1, w2, b2)


def decoder_forward_ref(x_pt, y_pt, params):
    """Pure-JAX f32 reference for correctness checking."""
    w1, b1, w2, b2 = params
    if x_pt.shape[1] > 0:
        mixed = jnp.concatenate(
            [x_pt.reshape(x_pt.shape[0], -1), y_pt.reshape(y_pt.shape[0], -1)],
            axis=1)
    else:
        mixed = y_pt.reshape(y_pt.shape[0], -1)
    h = jnp.maximum(mixed @ w1 + b1, 0.0)
    return h @ w2 + b2


if __name__ == "__main__":
    key = jax.random.PRNGKey(0)
    kx, ky, kp = jax.random.split(key, 3)

    # Small shapes consistent with the module's forward:
    #   x_pt: NCHW conditioning input -> flattened to x_space_size features
    #   y_pt: latent vector of z_space_size features
    batch = 8
    x_pt = jax.random.normal(kx, (batch, 4, 2, 2), jnp.float32)   # x_space = 16
    y_pt = jax.random.normal(ky, (batch, 32), jnp.float32)        # z_space = 32
    x_space_size = 4 * 2 * 2
    z_space_size = 32
    hidden_size = 64
    y_space_size = 16

    params = init_decoder_params(kp, x_space_size, z_space_size,
                                 hidden_size, y_space_size)
    ref = decoder_forward_ref(x_pt, y_pt, params)

    # 1) Structural check: f32 compute path must match the reference tightly.
    out_f32 = jax.block_until_ready(
        decoder_forward(x_pt, y_pt, params, compute_dtype=jnp.float32))
    assert out_f32.shape == (batch, y_space_size)
    assert jnp.allclose(out_f32, ref, atol=1e-5, rtol=1e-5), "f32 mismatch vs reference"

    # 2) bf16 fast path (default): looser tolerance for bf16 rounding.
    out_bf16 = jax.block_until_ready(decoder_forward(x_pt, y_pt, params))
    assert out_bf16.shape == (batch, y_space_size)
    assert jnp.allclose(out_bf16, ref, atol=5e-2, rtol=5e-2), "bf16 mismatch vs reference"

    # 3) Exercise the x_space == 0 branch of Decoder.forward.
    params0 = init_decoder_params(kp, 0, z_space_size, hidden_size, y_space_size)
    x_empty = jnp.zeros((batch, 0), jnp.float32)
    out0 = jax.block_until_ready(
        decoder_forward(x_empty, y_pt, params0, compute_dtype=jnp.float32))
    ref0 = decoder_forward_ref(x_empty, y_pt, params0)
    assert jnp.allclose(out0, ref0, atol=1e-5, rtol=1e-5), "x_space=0 mismatch"

    print("KERNEL_OK")
</pallas_src>

<mosaic_0001>
module attributes {stable_mosaic.version = 11 : i64} {
  func.func @_decoder_mlp_kernel_xy(%arg0: i32, %arg1: memref<128x16xf32, #tpu.memory_space<vmem>>, %arg2: memref<128x32xf32, #tpu.memory_space<vmem>>, %arg3: memref<16x128xf32, #tpu.memory_space<vmem>>, %arg4: memref<32x128xf32, #tpu.memory_space<vmem>>, %arg5: memref<1x128xf32, #tpu.memory_space<vmem>>, %arg6: memref<128x128xf32, #tpu.memory_space<vmem>>, %arg7: memref<1x128xf32, #tpu.memory_space<vmem>>, %arg8: memref<128x128xf32, #tpu.memory_space<vmem>>) attributes {dimension_semantics = [#tpu.dimension_semantics<parallel>], iteration_bounds = array<i64: 1>, scalar_prefetch = 0 : i64, scratch_operands = 0 : i64, tpu.core_type = #tpu.core_type<tc>, window_params = [{transform_indices = @transform_0, window_bounds = array<i64: 128, 16>}, {transform_indices = @transform_1, window_bounds = array<i64: 128, 32>}, {pipeline_mode = #tpu.pipeline_mode<synchronous>, transform_indices = @transform_2, window_bounds = array<i64: 16, 128>}, {pipeline_mode = #tpu.pipeline_mode<synchronous>, transform_indices = @transform_3, window_bounds = array<i64: 32, 128>}, {pipeline_mode = #tpu.pipeline_mode<synchronous>, transform_indices = @transform_4, window_bounds = array<i64: 1, 128>}, {pipeline_mode = #tpu.pipeline_mode<synchronous>, transform_indices = @transform_5, window_bounds = array<i64: 128, 128>}, {pipeline_mode = #tpu.pipeline_mode<synchronous>, transform_indices = @transform_6, window_bounds = array<i64: 1, 128>}, {transform_indices = @transform_7, window_bounds = array<i64: 128, 128>}]} {
    %c0 = arith.constant 0 : index
    %c0_0 = arith.constant 0 : index
    %0 = vector.load %arg1[%c0, %c0_0] : memref<128x16xf32, #tpu.memory_space<vmem>>, vector<128x16xf32>
    %c0_1 = arith.constant 0 : index
    %c0_2 = arith.constant 0 : index
    %1 = vector.load %arg3[%c0_1, %c0_2] : memref<16x128xf32, #tpu.memory_space<vmem>>, vector<16x128xf32>
    %cst = arith.constant dense<0.000000e+00> : vector<128x128xf32>
    %2 = tpu.matmul %0, %1, %cst {dimension_numbers = #tpu.dot_dimension_numbers<[1], [0], [0], [1], [0, 0, 1, 1], [], []>} : vector<128x16xf32>, vector<16x128xf32>, vector<128x128xf32> -> vector<128x128xf32>
    %c0_3 = arith.constant 0 : index
    %c0_4 = arith.constant 0 : index
    %3 = vector.load %arg2[%c0_3, %c0_4] : memref<128x32xf32, #tpu.memory_space<vmem>>, vector<128x32xf32>
    %c0_5 = arith.constant 0 : index
    %c0_6 = arith.constant 0 : index
    %4 = vector.load %arg4[%c0_5, %c0_6] : memref<32x128xf32, #tpu.memory_space<vmem>>, vector<32x128xf32>
    %cst_7 = arith.constant dense<0.000000e+00> : vector<128x128xf32>
    %5 = tpu.matmul %3, %4, %cst_7 {dimension_numbers = #tpu.dot_dimension_numbers<[1], [0], [0], [1], [0, 0, 1, 1], [], []>} : vector<128x32xf32>, vector<32x128xf32>, vector<128x128xf32> -> vector<128x128xf32>
    %6 = arith.addf %2, %5 : vector<128x128xf32>
    %c0_8 = arith.constant 0 : index
    %c0_9 = arith.constant 0 : index
    %7 = vector.load %arg5[%c0_8, %c0_9] : memref<1x128xf32, #tpu.memory_space<vmem>>, vector<1x128xf32>
    %8 = vector.broadcast %7 : vector<1x128xf32> to vector<128x128xf32>
    %9 = arith.addf %6, %8 : vector<128x128xf32>
    %cst_10 = arith.constant 0.000000e+00 : f32
    %10 = vector.broadcast %cst_10 : f32 to vector<128x128xf32>
    %11 = arith.maximumf %9, %10 : vector<128x128xf32>
    %c0_11 = arith.constant 0 : index
    %c0_12 = arith.constant 0 : index
    %12 = vector.load %arg6[%c0_11, %c0_12] : memref<128x128xf32, #tpu.memory_space<vmem>>, vector<128x128xf32>
    %cst_13 = arith.constant dense<0.000000e+00> : vector<128x128xf32>
    %13 = tpu.matmul %11, %12, %cst_13 {dimension_numbers = #tpu.dot_dimension_numbers<[1], [0], [0], [1], [0, 0, 1, 1], [], []>} : vector<128x128xf32>, vector<128x128xf32>, vector<128x128xf32> -> vector<128x128xf32>
    %c0_14 = arith.constant 0 : index
    %c0_15 = arith.constant 0 : index
    %14 = vector.load %arg7[%c0_14, %c0_15] : memref<1x128xf32, #tpu.memory_space<vmem>>, vector<1x128xf32>
    %15 = vector.broadcast %14 : vector<1x128xf32> to vector<128x128xf32>
    %16 = arith.addf %13, %15 : vector<128x128xf32>
    %c0_16 = arith.constant 0 : index
    %c0_17 = arith.constant 0 : index
    %17 = vector.load %arg8[%c0_16, %c0_17] : memref<128x128xf32, #tpu.memory_space<vmem>>, vector<128x128xf32>
    tpu.vector_store %arg8[%c0_16, %c0_17], %16 {strides = array<i32>} : memref<128x128xf32, #tpu.memory_space<vmem>>, vector<128x128xf32>,
    return
  }
  func.func @transform_0(%arg0: i32) -> (i32, i32) {
    %c0_i32 = arith.constant 0 : i32
    %c0_i32_0 = arith.constant 0 : i32
    return %arg0, %c0_i32 : i32, i32
  }
  func.func @transform_1(%arg0: i32) -> (i32, i32) {
    %c0_i32 = arith.constant 0 : i32
    %c0_i32_0 = arith.constant 0 : i32
    return %arg0, %c0_i32 : i32, i32
  }
  func.func @transform_2(%arg0: i32) -> (i32, i32) {
    %c0_i32 = arith.constant 0 : i32
    %c0_i32_0 = arith.constant 0 : i32
    %c0_i32_1 = arith.constant 0 : i32
    return %c0_i32, %c0_i32_0 : i32, i32
  }
  func.func @transform_3(%arg0: i32) -> (i32, i32) {
    %c0_i32 = arith.constant 0 : i32
    %c0_i32_0 = arith.constant 0 : i32
    %c0_i32_1 = arith.constant 0 : i32
    return %c0_i32, %c0_i32_0 : i32, i32
  }
  func.func @transform_4(%arg0: i32) -> (i32, i32) {
    %c0_i32 = arith.constant 0 : i32
    %c0_i32_0 = arith.constant 0 : i32
    %c0_i32_1 = arith.constant 0 : i32
    return %c0_i32, %c0_i32_0 : i32, i32
  }
  func.func @transform_5(%arg0: i32) -> (i32, i32) {
    %c0_i32 = arith.constant 0 : i32
    %c0_i32_0 = arith.constant 0 : i32
    %c0_i32_1 = arith.constant 0 : i32
    return %c0_i32, %c0_i32_0 : i32, i32
  }
  func.func @transform_6(%arg0: i32) -> (i32, i32) {
    %c0_i32 = arith.constant 0 : i32
    %c0_i32_0 = arith.constant 0 : i32
    %c0_i32_1 = arith.constant 0 : i32
    return %c0_i32, %c0_i32_0 : i32, i32
  }
  func.func @transform_7(%arg0: i32) -> (i32, i32) {
    %c0_i32 = arith.constant 0 : i32
    %c0_i32_0 = arith.constant 0 : i32
    return %arg0, %c0_i32 : i32, i32
  }
}

</mosaic_0001>

<bundles_post_ra>
// kernel: tpu_custom_call.1
= control target key start
LH: loop header
LB: loop body
LE: loop exit
PB: predicated region body
PF: predicated region fallthrough
CT: control target
= control target key end

     0   :  { %vm259_vm0 = vcmask 130048   ;;  %vm65_vm1 = vcmask 261120   ;;  %s1288_s0 = inlined_call_operand.vmem [shape: f32[128,16], index: 0, kind: input, shape index: {}]   ;;  %s1289_s1 = inlined_call_operand.vmem [shape: f32[128,32], index: 1, kind: input, shape index: {}]   ;;  %s1290_s2 = inlined_call_operand.vmem [shape: f32[16,128], index: 2, kind: input, shape index: {}]   ;;  %s1291_s3 = inlined_call_operand.vmem [shape: f32[32,128], index: 3, kind: input, shape index: {}]   ;;  %s1292_s4 = inlined_call_operand.vmem [shape: f32[1,128], index: 4, kind: input, shape index: {}]   ;;  %s1293_s5 = inlined_call_operand.vmem [shape: f32[128,128], index: 5, kind: input, shape index: {}]   ;;  %s1294_s6 = inlined_call_operand.vmem [shape: f32[1,128], index: 6, kind: input, shape index: {}]   ;;  %s1295_s7 = inlined_call_operand.hbm [shape: f32[128,128], index: 7, kind: output, shape index: {}]  }
   0x1   :  { %v61_v0 = vld [vmem:[%s1291_s3] sm:$0xff]  ;;  %v62_v1 = vld [vmem:[%s1291_s3 + $0x8] sm:$0xff]  ;;  %v63_v5 = vld [vmem:[%s1291_s3 + $0x10] sm:$0xff] }
   0x2   :  { %v43_v2 = vld [vmem:[%s1290_s2] sm:$0xff]  ;;  %v912_v3 = vpack.c.bf16 %v62_v1, %v61_v0  ;;  %v44_v4 = vld [vmem:[%s1290_s2 + $0x8] sm:$0xff]  ;;  %v64_v6 = vld [vmem:[%s1291_s3 + $0x18] sm:$0xff] }
   0x3   :  { %v920_v7 = vpack.c.bf16 %v44_v4, %v43_v2  ;;  %v916_v8 = vpack.c.bf16 %v64_v6, %v63_v5  ;;  %v27_v9 = vld [vmem:[%s1288_s0] sm:$0xff]  ;;  %v28_v11 = vld [vmem:[%s1288_s0 + $0x8] sm:$0xff]  ;;  %v29_v12 = vld [vmem:[%s1288_s0 + $0x10] sm:$0xff] }
   0x4   :  { %913 = vmatprep.subr.bf16.mxu0 %v912_v3  ;;  %832 = vmatprep.mubr.msk.f32.mxu1 %vm259_vm0, %v27_v9  ;;  %v45_v10 = vld [vmem:[%s1289_s1] sm:$0xff]  ;;  %v46_v13 = vld [vmem:[%s1289_s1 + $0x8] sm:$0xff]  ;;  %v47_v14 = vld [vmem:[%s1289_s1 + $0x10] sm:$0xff] }
   0x5   :  { %915 = vmatpush3.bf16.msra.mxu0 %v912_v3  ;;  %921 = vmatprep.subr.bf16.mxu1 %v920_v7  ;;  %v30_v15 = vld [vmem:[%s1288_s0 + $0x18] sm:$0xff]  ;;  %v31_v16 = vld [vmem:[%s1288_s0 + $0x20] sm:$0xff]  ;;  %v32_v19 = vld [vmem:[%s1288_s0 + $0x28] sm:$0xff] }
   0x6   :  { %917 = vmatprep.subr.bf16.mxu0 %v916_v8  ;;  %923 = vmatpush3.bf16.msra.mxu1 %v920_v7  ;;  %v48_v17 = vld [vmem:[%s1289_s1 + $0x18] sm:$0xff]  ;;  %v49_v18 = vld [vmem:[%s1289_s1 + $0x20] sm:$0xff]  ;;  %v493_v21 = vld [vmem:[%s1293_s5 + $0x8] sm:$0xff] }
   0x7   :  { %804 = vmatprep.mubr.msk.f32.mxu0 %vm65_vm1, %v45_v10  ;;  %v492_v20 = vld [vmem:[%s1293_s5] sm:$0xff]  ;;  %v494_v22 = vld [vmem:[%s1293_s5 + $0x10] sm:$0xff]  ;;  %v495_v23 = vld [vmem:[%s1293_s5 + $0x18] sm:$0xff] }
   0x8   :  { %v33_v24 = vld [vmem:[%s1288_s0 + $0x30] sm:$0xff]  ;;  %v924_v25 = vpack.c.bf16 %v493_v21, %v492_v20  ;;  %v50_v26 = vld [vmem:[%s1289_s1 + $0x28] sm:$0xff]  ;;  %v928_v27 = vpack.c.bf16 %v495_v23, %v494_v22  ;;  %v496_v28 = vld [vmem:[%s1293_s5 + $0x20] sm:$0xff] }
   0x9   :  { %919 = vmatpush3.bf16.msra.mxu0 %v916_v8  ;;  %833 = vmatmul.mubr.msk.f32.vlgmr.msra.gmra.mrb[0].mxu1 %vm259_vm0, %v28_v11  ;;  %v497_v29 = vld [vmem:[%s1293_s5 + $0x28] sm:$0xff] }
   0xa   :  { %835 = vmatprep.mubr.msk.f32.mxu1 %vm259_vm0, %v29_v12 }
   0xc   :  { %805 = vmatmul.mubr.msk.f32.vlgmr.msra.gmra.mrb[0].mxu0 %vm65_vm1, %v46_v13 }
   0xd   :  { %807 = vmatprep.mubr.msk.f32.mxu0 %vm65_vm1, %v47_v14  ;;  %836 = vmatmul.mubr.msk.f32.gmra.mrb[2].mxu1 %vm259_vm0, %v30_v15 }
   0xe   :  { %838 = vmatprep.mubr.msk.f32.mxu1 %vm259_vm0, %v31_v16 }
  0x10   :  { %808 = vmatmul.mubr.msk.f32.gmra.mrb[2].mxu0 %vm65_vm1, %v48_v17 }
  0x11   :  { %810 = vmatprep.mubr.msk.f32.mxu0 %vm65_vm1, %v49_v18  ;;  %839 = vmatmul.mubr.msk.f32.gmra.mrb[4].mxu1 %vm259_vm0, %v32_v19 }
  0x12   :  { %12 = vsyncpa [#allocation3], 0  ;;  %841 = vmatprep.mubr.msk.f32.mxu1 %vm259_vm0, %v33_v24  ;;  %v51_v30 = vld [vmem:[%s1289_s1 + $0x30] sm:$0xff]  ;;  %v34_v31 = vld [vmem:[%s1288_s0 + $0x38] sm:$0xff]  ;;  %925 = vmatprep.subr.bf16.mxu0 %v924_v25  ;;  %v932_v33 = vpack.c.bf16 %v497_v29, %v496_v28 }
  0x13   :  { %v35_v32 = vld [vmem:[%s1288_s0 + $0x40] sm:$0xff]  ;;  %927 = vmatpush3.bf16.msra.mxu0 %v924_v25  ;;  %956 = vmatprep.subr.bf16.mxu1 %v924_v25  ;;  %v52_v34 = vld [vmem:[%s1289_s1 + $0x38] sm:$0xff]  ;;  %v498_v35 = vld [vmem:[%s1293_s5 + $0x30] sm:$0xff] }
  0x14   :  { %811 = vmatmul.mubr.msk.f32.gmra.mrb[4].mxu0 %vm65_vm1, %v50_v26  ;;  %929 = vmatprep.subr.bf16.mxu0 %v928_v27  ;;  %v499_v36 = vld [vmem:[%s1293_s5 + $0x38] sm:$0xff]  ;;  %v53_v37 = vld [vmem:[%s1289_s1 + $0x40] sm:$0xff]  ;;  %v36_v38 = vld [vmem:[%s1288_s0 + $0x48] sm:$0xff] }
  0x15   :  { %813 = vmatprep.mubr.msk.f32.mxu0 %vm65_vm1, %v51_v30  ;;  %842 = vmatmul.mubr.msk.f32.gmra.mrb[6].mxu1 %vm259_vm0, %v34_v31  ;;  %v37_v39 = vld [vmem:[%s1288_s0 + $0x50] sm:$0xff]  ;;  %v936_v40 = vpack.c.bf16 %v499_v36, %v498_v35  ;;  %v54_v41 = vld [vmem:[%s1289_s1 + $0x48] sm:$0xff]  ;;  %v500_v42 = vld [vmem:[%s1293_s5 + $0x40] sm:$0xff] }
  0x16   :  { %844 = vmatprep.mubr.msk.f32.mxu1 %vm259_vm0, %v35_v32  ;;  %964 = vmatpush3.bf16.msra.mxu1 %v924_v25  ;;  %v501_v43 = vld [vmem:[%s1293_s5 + $0x48] sm:$0xff]  ;;  %v55_v44 = vld [vmem:[%s1289_s1 + $0x50] sm:$0xff]  ;;  %v38_v45 = vld [vmem:[%s1288_s0 + $0x58] sm:$0xff] }
  0x17   :  { %931 = vmatpush3.bf16.msra.mxu0 %v928_v27  ;;  %957 = vmatprep.subr.bf16.mxu1 %v928_v27  ;;  %v39_v46 = vld [vmem:[%s1288_s0 + $0x60] sm:$0xff]  ;;  %v940_v47 = vpack.c.bf16 %v501_v43, %v500_v42  ;;  %v56_v48 = vld [vmem:[%s1289_s1 + $0x58] sm:$0xff]  ;;  %v502_v49 = vld [vmem:[%s1293_s5 + $0x50] sm:$0xff] }
  0x18   :  { %814 = vmatmul.mubr.msk.f32.gmra.mrb[6].mxu0 %vm65_vm1, %v52_v34  ;;  %933 = vmatprep.subr.bf16.mxu0 %v932_v33  ;;  %v503_v50 = vld [vmem:[%s1293_s5 + $0x58] sm:$0xff]  ;;  %v57_v51 = vld [vmem:[%s1289_s1 + $0x60] sm:$0xff]  ;;  %v40_v52 = vld [vmem:[%s1288_s0 + $0x68] sm:$0xff] }
  0x19   :  { %816 = vmatprep.mubr.msk.f32.mxu0 %vm65_vm1, %v53_v37  ;;  %845 = vmatmul.mubr.msk.f32.gmra.mrb[8].mxu1 %vm259_vm0, %v36_v38  ;;  %v41_v53 = vld [vmem:[%s1288_s0 + $0x70] sm:$0xff]  ;;  %v944_v54 = vpack.c.bf16 %v503_v50, %v502_v49  ;;  %v58_v55 = vld [vmem:[%s1289_s1 + $0x68] sm:$0xff]  ;;  %v42_v57 = vld [vmem:[%s1288_s0 + $0x78] sm:$0xff] }
  0x1a   :  { %847 = vmatprep.mubr.msk.f32.mxu1 %vm259_vm0, %v37_v39  ;;  %965 = vmatpush3.bf16.msra.mxu1 %v928_v27  ;;  %v59_v56 = vld [vmem:[%s1289_s1 + $0x70] sm:$0xff]  ;;  %v60_v58 = vld [vmem:[%s1289_s1 + $0x78] sm:$0xff]  ;;  %v504_v59 = vld [vmem:[%s1293_s5 + $0x60] sm:$0xff] }
  0x1b   :  { %935 = vmatpush3.bf16.msra.mxu0 %v932_v33  ;;  %958 = vmatprep.subr.bf16.mxu1 %v932_v33  ;;  %v505_v60 = vld [vmem:[%s1293_s5 + $0x68] sm:$0xff]  ;;  %v506_v62 = vld [vmem:[%s1293_s5 + $0x70] sm:$0xff]  ;;  %v507_v63 = vld [vmem:[%s1293_s5 + $0x78] sm:$0xff] }
  0x1c   :  { %817 = vmatmul.mubr.msk.f32.gmra.mrb[8].mxu0 %vm65_vm1, %v54_v41  ;;  %937 = vmatprep.subr.bf16.mxu0 %v936_v40  ;;  %v948_v61 = vpack.c.bf16 %v505_v60, %v504_v59  ;;  %v952_v0 = vpack.c.bf16 %v507_v63, %v506_v62  ;;  %v1255_v4 = vld [vmem:[%s1292_s4] ss:$0 sm:$0xff] }
  0x1d   :  { %819 = vmatprep.mubr.msk.f32.mxu0 %vm65_vm1, %v55_v44  ;;  %848 = vmatmul.mubr.msk.f32.gmra.mrb[10].mxu1 %vm259_vm0, %v38_v45 }
  0x1e   :  { %850 = vmatprep.mubr.msk.f32.mxu1 %vm259_vm0, %v39_v46  ;;  %966 = vmatpush3.bf16.msra.mxu1 %v932_v33 }
  0x1f   :  { %939 = vmatpush3.bf16.msra.mxu0 %v936_v40  ;;  %959 = vmatprep.subr.bf16.mxu1 %v936_v40 }
  0x20   :  { %820 = vmatmul.mubr.msk.f32.gmra.mrb[10].mxu0 %vm65_vm1, %v56_v48  ;;  %941 = vmatprep.subr.bf16.mxu0 %v940_v47 }
  0x21   :  { %822 = vmatprep.mubr.msk.f32.mxu0 %vm65_vm1, %v57_v51  ;;  %851 = vmatmul.mubr.msk.f32.gmra.mrb[12].mxu1 %vm259_vm0, %v40_v52 }
  0x22   :  { %853 = vmatprep.mubr.msk.f32.mxu1 %vm259_vm0, %v41_v53  ;;  %967 = vmatpush3.bf16.msra.mxu1 %v936_v40 }
  0x23   :  { %943 = vmatpush3.bf16.msra.mxu0 %v940_v47  ;;  %960 = vmatprep.subr.bf16.mxu1 %v940_v47 }
  0x24   :  { %823 = vmatmul.mubr.msk.f32.gmra.mrb[12].mxu0 %vm65_vm1, %v58_v55  ;;  %945 = vmatprep.subr.bf16.mxu0 %v944_v54 }
  0x25   :  { %825 = vmatprep.mubr.msk.f32.mxu0 %vm65_vm1, %v59_v56  ;;  %854 = vmatmul.mubr.msk.f32.gmra.mrb[14].mxu1 %vm259_vm0, %v42_v57 }
  0x26   :  { %968 = vmatpush3.bf16.msra.mxu1 %v940_v47 }
  0x27   :  { %947 = vmatpush3.bf16.msra.mxu0 %v944_v54  ;;  %961 = vmatprep.subr.bf16.mxu1 %v944_v54 }
  0x28   :  { %826 = vmatmul.mubr.msk.f32.gmra.mrb[14].mxu0 %vm65_vm1, %v60_v58  ;;  %949 = vmatprep.subr.bf16.mxu0 %v948_v61 }
  0x2a   :  { %969 = vmatpush3.bf16.msra.mxu1 %v944_v54 }
  0x2b   :  { %962 = vmatprep.subr.bf16.mxu1 %v948_v61  ;;  %951 = vmatpush3.bf16.msra.mxu0 %v948_v61 }
  0x2c   :  { %953 = vmatprep.subr.bf16.mxu0 %v952_v0 }
  0x2e   :  { %970 = vmatpush3.bf16.msra.mxu1 %v948_v61 }
  0x2f   :  { %963 = vmatprep.subr.bf16.mxu1 %v952_v0  ;;  %955 = vmatpush3.bf16.msra.mxu0 %v952_v0 }
  0x32   :  { %971 = vmatpush3.bf16.msra.mxu1 %v952_v0 }
  0xdc   :  { %v834_v1 = vpop.f32.mrb[0].mxu1 }
  0xdd   :  { %v374_v2 = vpop.f32.mrb[1].mxu1 }
  0xdf   :  { %v806_v3 = vpop.f32.mrb[0].mxu0 }
  0xe0   :  { %v380_v5 = vadd.f32 %v834_v1, %v806_v3  ;;  %v180_v6 = vpop.f32.mrb[1].mxu0  ;;  %v837_v7 = vpop.f32.mrb[2].mxu1 }
  0xe1   :  { %v375_v8 = vadd.f32 %v374_v2, %v180_v6  ;;  %v384_v9 = vpop.f32.mrb[3].mxu1 }
  0xe2   :  { %v461_v10 = vadd.f32 %v1255_v4, %v380_v5 }
  0xe3   :  { %v460_v11 = vadd.f32 %v1255_v4, %v375_v8  ;;  %v809_v12 = vpop.f32.mrb[2].mxu0 }
  0xe4   :  { %v390_v13 = vadd.f32 %v837_v7, %v809_v12  ;;  %v190_v14 = vpop.f32.mrb[3].mxu0  ;;  %v840_v15 = vpop.f32.mrb[4].mxu1  ;;  %v477_v19 = vmax.f32 %v461_v10, 0.0 }
  0xe5   :  { %v476_v16 = vmax.f32 %v460_v11, 0.0  ;;  %v385_v17 = vadd.f32 %v384_v9, %v190_v14  ;;  %v394_v18 = vpop.f32.mrb[5].mxu1 }
  0xe6   :  { %v463_v20 = vadd.f32 %v1255_v4, %v390_v13 }
  0xe7   :  { %v462_v21 = vadd.f32 %v1255_v4, %v385_v17  ;;  %v812_v22 = vpop.f32.mrb[4].mxu0  ;;  %888 = vmatprep.mubr.f32.mxu0 %v476_v16 }
  0xe8   :  { %v400_v23 = vadd.f32 %v840_v15, %v812_v22  ;;  %v200_v24 = vpop.f32.mrb[5].mxu0  ;;  %889 = vmatmul.mubr.f32.vlgmr.msra.gmra.mrb[16].mxu0 %v477_v19  ;;  %v843_v25 = vpop.f32.mrb[6].mxu1  ;;  %v479_v29 = vmax.f32 %v463_v20, 0.0  ;;  %v725_v19 = vld [vmem:[%s1294_s6] ss:$0 sm:$0xff]  ;;  %s1015_s6 = smov [#allocation2]  }
  0xe9   :  { %v478_v26 = vmax.f32 %v462_v21, 0.0  ;;  %v395_v27 = vadd.f32 %v394_v18, %v200_v24  ;;  %v404_v28 = vpop.f32.mrb[7].mxu1  ;;  %s681_s9 = sshll.u32 %s1015_s6, 4  ;;  %s682_s9 = int_to_ptr.vmem [resolvable:$true] %s681_s9 }
  0xea   :  { %v465_v30 = vadd.f32 %v1255_v4, %v400_v23  ;;  %s991_s10 = scalar_lea.vmem %s682_s9, 2048  ;;  %p996_p1 = scmp.lt.s32.totalorder %s682_s9, %s682_s9 }
  0xeb   :  { %v464_v31 = vadd.f32 %v1255_v4, %v395_v27  ;;  %v815_v32 = vpop.f32.mrb[6].mxu0  ;;  %891 = vmatprep.mubr.f32.mxu0 %v478_v26  ;;  %p992_p0 = scmp.ne.s32.totalorder %s682_s9, %s991_s10  ;;  %p997_p2 = scmp.lt.s32.totalorder %s991_s10, %s991_s10 }
  0xec   :  { %v410_v33 = vadd.f32 %v843_v25, %v815_v32  ;;  %v210_v34 = vpop.f32.mrb[7].mxu0  ;;  %892 = vmatmul.mubr.f32.gmra.mrb[18].mxu0 %v479_v29  ;;  %v846_v35 = vpop.f32.mrb[8].mxu1  ;;  %v481_v39 = vmax.f32 %v465_v30, 0.0 }
  0xed   :  { %v480_v36 = vmax.f32 %v464_v31, 0.0  ;;  %v405_v37 = vadd.f32 %v404_v28, %v210_v34  ;;  %v414_v38 = vpop.f32.mrb[9].mxu1  ;;  %p998_p3 = por %p997_p2, %p996_p1 }
  0xee   :  { %v467_v40 = vadd.f32 %v1255_v4, %v410_v33 }
  0xef   :  { %v466_v41 = vadd.f32 %v1255_v4, %v405_v37  ;;  %v818_v42 = vpop.f32.mrb[8].mxu0  ;;  %894 = vmatprep.mubr.f32.mxu0 %v480_v36  ;;  %p999_p4 = pnand %p998_p3, %p992_p0 }
  0xf0   :  { %v420_v43 = vadd.f32 %v846_v35, %v818_v42  ;;  %v220_v44 = vpop.f32.mrb[9].mxu0  ;;  %895 = vmatmul.mubr.f32.gmra.mrb[20].mxu0 %v481_v39  ;;  %v849_v45 = vpop.f32.mrb[10].mxu1  ;;  %v483_v49 = vmax.f32 %v467_v40, 0.0 }
  0xf1   :  { %v482_v46 = vmax.f32 %v466_v41, 0.0  ;;  %v415_v47 = vadd.f32 %v414_v38, %v220_v44  ;;  %v424_v48 = vpop.f32.mrb[11].mxu1 }
  0xf2   :  { %v469_v50 = vadd.f32 %v1255_v4, %v420_v43 }
  0xf3   :  { %v468_v51 = vadd.f32 %v1255_v4, %v415_v47  ;;  %v821_v52 = vpop.f32.mrb[10].mxu0  ;;  %897 = vmatprep.mubr.f32.mxu1 %v482_v46 }
  0xf4   :  { %v430_v53 = vadd.f32 %v849_v45, %v821_v52  ;;  %v230_v54 = vpop.f32.mrb[11].mxu0  ;;  %898 = vmatmul.mubr.f32.vlgmr.msra.gmra.mrb[16].mxu1 %v483_v49  ;;  %v852_v55 = vpop.f32.mrb[12].mxu1  ;;  %v485_v59 = vmax.f32 %v469_v50, 0.0 }
  0xf5   :  { %v484_v56 = vmax.f32 %v468_v51, 0.0  ;;  %v425_v57 = vadd.f32 %v424_v48, %v230_v54  ;;  %v434_v58 = vpop.f32.mrb[13].mxu1 }
  0xf6   :  { %v471_v60 = vadd.f32 %v1255_v4, %v430_v53 }
  0xf7   :  { %v470_v61 = vadd.f32 %v1255_v4, %v425_v57  ;;  %v824_v62 = vpop.f32.mrb[12].mxu0  ;;  %900 = vmatprep.mubr.f32.mxu1 %v484_v56 }
  0xf8   :  { %v440_v63 = vadd.f32 %v852_v55, %v824_v62  ;;  %v240_v0 = vpop.f32.mrb[13].mxu0  ;;  %901 = vmatmul.mubr.f32.gmra.mrb[18].mxu1 %v485_v59  ;;  %v855_v1 = vpop.f32.mrb[14].mxu1  ;;  %v487_v6 = vmax.f32 %v471_v60, 0.0 }
  0xf9   :  { %v486_v2 = vmax.f32 %v470_v61, 0.0  ;;  %v435_v3 = vadd.f32 %v434_v58, %v240_v0  ;;  %v444_v5 = vpop.f32.mrb[15].mxu1 }
  0xfa   :  { %v473_v7 = vadd.f32 %v1255_v4, %v440_v63 }
  0xfb   :  { %v472_v8 = vadd.f32 %v1255_v4, %v435_v3  ;;  %v827_v9 = vpop.f32.mrb[14].mxu0  ;;  %903 = vmatprep.mubr.f32.mxu1 %v486_v2 }
  0xfc   :  { %v450_v10 = vadd.f32 %v855_v1, %v827_v9  ;;  %v250_v11 = vpop.f32.mrb[15].mxu0  ;;  %904 = vmatmul.mubr.f32.gmra.mrb[20].mxu1 %v487_v6  ;;  %v489_v14 = vmax.f32 %v473_v7, 0.0 }
  0xfd   :  { %v488_v12 = vmax.f32 %v472_v8, 0.0  ;;  %v445_v13 = vadd.f32 %v444_v5, %v250_v11 }
  0xfe   :  { %v475_v15 = vadd.f32 %v1255_v4, %v450_v10 }
  0xff   :  { %v474_v16 = vadd.f32 %v1255_v4, %v445_v13  ;;  %906 = vmatprep.mubr.f32.mxu1 %v488_v12 }
 0x100   :  { %907 = vmatmul.mubr.f32.gmra.mrb[22].mxu1 %v489_v14  ;;  %v491_v18 = vmax.f32 %v475_v15, 0.0 }
 0x101   :  { %v490_v17 = vmax.f32 %v474_v16, 0.0 }
 0x103   :  { %909 = vmatprep.mubr.f32.mxu1 %v490_v17 }
 0x104   :  { %910 = vmatmul.mubr.f32.gmra.mrb[24].mxu1 %v491_v18 }
 0x1bb   :  { %v890_v20 = vpop.f32.mrb[16].mxu0 }
 0x1bc   :  { %v587_v21 = vadd.f32 %v890_v20, %v725_v19  ;;  %v581_v22 = vpop.f32.mrb[17].mxu0 }
 0x1bd   :  { %v582_v23 = vadd.f32 %v725_v19, %v581_v22 }
 0x1be   :  { %661 = vst [vmem:[#allocation2 + $0x8] sm:$0xff] %v587_v21 }
 0x1bf   :  { %660 = vst [vmem:[#allocation2] sm:$0xff] %v582_v23  ;;  %v893_v24 = vpop.f32.mrb[18].mxu0 }
 0x1c0   :  { %v597_v25 = vadd.f32 %v893_v24, %v725_v19  ;;  %v591_v26 = vpop.f32.mrb[19].mxu0 }
 0x1c1   :  { %v592_v4 = vadd.f32 %v725_v19, %v591_v26 }
 0x1c2   :  { %663 = vst [vmem:[#allocation2 + $0x18] sm:$0xff] %v597_v25 }
 0x1c3   :  { %662 = vst [vmem:[#allocation2 + $0x10] sm:$0xff] %v592_v4  ;;  %v896_v27 = vpop.f32.mrb[20].mxu0 }
 0x1c4   :  { %v607_v28 = vadd.f32 %v896_v27, %v725_v19  ;;  %v601_v29 = vpop.f32.mrb[21].mxu0 }
 0x1c5   :  { %v602_v30 = vadd.f32 %v725_v19, %v601_v29 }
 0x1c6   :  { %665 = vst [vmem:[#allocation2 + $0x28] sm:$0xff] %v607_v28 }
 0x1c7   :  { %664 = vst [vmem:[#allocation2 + $0x20] sm:$0xff] %v602_v30  ;;  %v899_v31 = vpop.f32.mrb[16].mxu1 }
 0x1c8   :  { %v617_v32 = vadd.f32 %v899_v31, %v725_v19  ;;  %v611_v33 = vpop.f32.mrb[17].mxu1 }
 0x1c9   :  { %v612_v34 = vadd.f32 %v725_v19, %v611_v33 }
 0x1ca   :  { %667 = vst [vmem:[#allocation2 + $0x38] sm:$0xff] %v617_v32 }
 0x1cb   :  { %666 = vst [vmem:[#allocation2 + $0x30] sm:$0xff] %v612_v34  ;;  %v902_v35 = vpop.f32.mrb[18].mxu1 }
 0x1cc   :  { %v627_v36 = vadd.f32 %v902_v35, %v725_v19  ;;  %v621_v37 = vpop.f32.mrb[19].mxu1 }
 0x1cd   :  { %v622_v38 = vadd.f32 %v725_v19, %v621_v37 }
 0x1ce   :  { %669 = vst [vmem:[#allocation2 + $0x48] sm:$0xff] %v627_v36 }
 0x1cf   :  { %668 = vst [vmem:[#allocation2 + $0x40] sm:$0xff] %v622_v38  ;;  %v905_v39 = vpop.f32.mrb[20].mxu1 }
 0x1d0   :  { %v637_v40 = vadd.f32 %v905_v39, %v725_v19  ;;  %v631_v41 = vpop.f32.mrb[21].mxu1 }
 0x1d1   :  { %v632_v42 = vadd.f32 %v725_v19, %v631_v41 }
 0x1d2   :  { %671 = vst [vmem:[#allocation2 + $0x58] sm:$0xff] %v637_v40 }
 0x1d3   :  { %670 = vst [vmem:[#allocation2 + $0x50] sm:$0xff] %v632_v42  ;;  %v908_v43 = vpop.f32.mrb[22].mxu1 }
 0x1d4   :  { %v647_v44 = vadd.f32 %v908_v43, %v725_v19  ;;  %v641_v45 = vpop.f32.mrb[23].mxu1 }
 0x1d5   :  { %v642_v46 = vadd.f32 %v725_v19, %v641_v45 }
 0x1d6   :  { %673 = vst [vmem:[#allocation2 + $0x68] sm:$0xff] %v647_v44 }
 0x1d7   :  { %672 = vst [vmem:[#allocation2 + $0x60] sm:$0xff] %v642_v46  ;;  %v911_v47 = vpop.f32.mrb[24].mxu1 }
 0x1d8   :  { %v657_v48 = vadd.f32 %v911_v47, %v725_v19  ;;  %v651_v49 = vpop.f32.mrb[25].mxu1 }
 0x1d9   :  { %v652_v50 = vadd.f32 %v725_v19, %v651_v49 }
 0x1da   :  { %675 = vst [vmem:[#allocation2 + $0x78] sm:$0xff] %v657_v48 }
 0x1db   :  { %674 = vst [vmem:[#allocation2 + $0x70] sm:$0xff] %v652_v50 }
 0x1dc   :  { %1002 = shalt.err (!%p999_p4)
}
 0x1dd   :  { %s1003_s13 = scalar_lea.hbm %s1295_s7, 2048 }
 0x1de   :  { %p1004_p5 = scmp.ne.s32.totalorder %s1295_s7, %s1003_s13  ;;  %p1007_p6 = scmp.lt.u32.totalorder %s1003_s13, %s1295_s7 }
 0x1e0   :  { %p1009_p7 = pnand %p1007_p6, %p1004_p5 }
 0x1e2   :  { %1012 = shalt.err (!%p1009_p7)
}
 0x1e3   :  { %s1016_s3 = smov 128   ;;  %s1017_s17 = smov 8  }
 0x1e4   :  { %687 = dma.vmem_to_hbm [thread:$0]  %s682_s9, 2048, %s1295_s7, [#allocation3], %s1016_s3, %s1016_s3, %s1017_s17  }
 0x1e5   :  { %1013 = dma.done.wait [#allocation3], 2048  }
 0x1e6   :  { %1014 = vsyncadd [#allocation3], 4294965248 }
 0x1e7   :  { %691 = vsyncpa [#allocation3], 1 }

</bundles_post_ra>
